<compile_context>
chip_gen: v6e
topology: v6e:2x2x1
jax: 0.10.0
libtpu: 0.0.40
codegen_flags: <defaults>
</compile_context>

<pallas_src>
import jax
import jax.numpy as jnp
from jax.experimental import pallas as pl
from jax.experimental.pallas import tpu as pltpu


def _round_up(x, m):
    return (x + m - 1) // m * m


def _choose_tiling(batch, max_tile=2048):
    """Pad batch only to a multiple of 128; tile so every tile is lane-dense."""
    b128 = _round_up(batch, 128)
    if b128 <= max_tile:
        return b128, b128, 1                      # single tile, no extra grid steps
    n_tiles = -(-b128 // max_tile)                # cdiv
    tile_b = _round_up(-(-b128 // n_tiles), 128)  # even split, 128-aligned
    return n_tiles * tile_b, tile_b, n_tiles


def critic_kernel(xT_ref, w1T_ref, b1_ref, w2_ref, b2_ref, out_ref):
    # xT_ref : (S, TILE_B)     w1T_ref: (H, S)
    # b1_ref : (H, 1)          w2_ref : (H, 1)
    # b2_ref : (1,) in SMEM    out_ref: (1, TILE_B)
    hT = jnp.dot(w1T_ref[...], xT_ref[...], preferred_element_type=jnp.float32)
    hT = jnp.maximum(hT + b1_ref[...], 0.0)                 # bias + ReLU on the VPU
    # Second (1-wide) linear layer: elementwise multiply + sublane reduction
    # (XLU slot) instead of driving the MXU for a single output column.
    v = jnp.sum(hT * w2_ref[...], axis=0, keepdims=True)    # (1, TILE_B)
    out_ref[...] = (v + b2_ref[0]).astype(out_ref.dtype)


def critic_forward(x, w1, b1, w2, b2, *, max_tile=2048):
    """value = relu(x @ w1 + b1) @ w2 + b2, with w1:(S,H), w2:(H,1)."""
    batch, state_space = x.shape
    hidden = w1.shape[1]
    out_size = w2.shape[1]
    assert out_size == 1, "Critic value head has a single output"
    dtype = x.dtype

    b_pad, tile_b, n_tiles = _choose_tiling(batch, max_tile)

    # --- one-time parameter prep (would be cached in a real training loop) ---
    w1T = w1.T                                   # (H, S), resident in VMEM
    b1c = b1.reshape(hidden, 1)
    w2c = w2.reshape(hidden, 1)
    b2s = b2.reshape(1).astype(dtype)            # scalar bias -> SMEM

    # --- layout plumbing on the activation: batch -> lane axis ---
    xT = x.T                                     # (S, batch); no feature padding
    if b_pad != batch:
        xT = jnp.pad(xT, ((0, 0), (0, b_pad - batch)))

    out = pl.pallas_call(
        critic_kernel,
        out_shape=jax.ShapeDtypeStruct((1, b_pad), dtype),
        grid_spec=pltpu.PrefetchScalarGridSpec(
            num_scalar_prefetch=0,
            grid=(n_tiles,),
            in_specs=[
                # streamed per batch tile
                pl.BlockSpec((state_space, tile_b), lambda i: (0, i)),
                # weights/biases: constant index maps -> stay resident in VMEM
                pl.BlockSpec((hidden, state_space), lambda i: (0, 0)),
                pl.BlockSpec((hidden, 1), lambda i: (0, 0)),
                pl.BlockSpec((hidden, 1), lambda i: (0, 0)),
                # scalar output bias lives in SMEM
                pl.BlockSpec(memory_space=pltpu.MemorySpace.SMEM),
            ],
            out_specs=pl.BlockSpec((1, tile_b), lambda i: (0, i)),
        ),
        compiler_params=pltpu.CompilerParams(
            dimension_semantics=("parallel",)),
    )(xT, w1T, b1c, w2c, b2s)

    # Slice the lane axis first (cheap), then reshape to the (batch, 1) convention.
    return out[:, :batch].reshape(batch, 1)


def init_linear(key, fan_in, fan_out, dtype=jnp.float32):
    # Mimics PyTorch's default U(-1/sqrt(fan_in), +1/sqrt(fan_in)) init.
    kw, kb = jax.random.split(key)
    bound = 1.0 / jnp.sqrt(jnp.asarray(fan_in, dtype))
    w = jax.random.uniform(kw, (fan_in, fan_out), dtype, -bound, bound)
    b = jax.random.uniform(kb, (fan_out,), dtype, -bound, bound)
    return w, b


if __name__ == "__main__":
    state_space, hidden_size, output_size = 16, 32, 1

    key = jax.random.PRNGKey(0)
    kx, k1, k2, kx2 = jax.random.split(key, 4)

    w1, b1 = init_linear(k1, state_space, hidden_size)
    w2, b2 = init_linear(k2, hidden_size, output_size)

    ok = True
    # batch=384: exact multiple of 128 -> single tile, zero padding anywhere.
    # batch=200: exercises the lane-padding path (pads to 256, sliced back).
    for kk, batch in ((kx, 384), (kx2, 200)):
        x = jax.random.normal(kk, (batch, state_space), jnp.float32)
        value = critic_forward(x, w1, b1, w2, b2)
        jax.block_until_ready(value)

        # Pure-JAX reference of the same math.
        ref = jnp.maximum(x @ w1 + b1, 0.0) @ w2 + b2
        ok &= value.shape == (batch, output_size)
        ok &= bool(jnp.allclose(value, ref, atol=1e-5, rtol=1e-5))

    assert ok
    print("KERNEL_OK")
</pallas_src>

<mosaic_0001>
module attributes {stable_mosaic.version = 11 : i64} {
  func.func @critic_kernel(%arg0: i32, %arg1: memref<16x384xf32, #tpu.memory_space<vmem>>, %arg2: memref<32x16xf32, #tpu.memory_space<vmem>>, %arg3: memref<32x1xf32, #tpu.memory_space<vmem>>, %arg4: memref<32x1xf32, #tpu.memory_space<vmem>>, %arg5: memref<1xf32, #tpu.memory_space<smem>>, %arg6: memref<1x384xf32, #tpu.memory_space<vmem>>) attributes {dimension_semantics = [#tpu.dimension_semantics<parallel>], iteration_bounds = array<i64: 1>, scalar_prefetch = 0 : i64, scratch_operands = 0 : i64, tpu.core_type = #tpu.core_type<tc>, window_params = [{transform_indices = @transform_0, window_bounds = array<i64: 16, 384>}, {pipeline_mode = #tpu.pipeline_mode<synchronous>, transform_indices = @transform_1, window_bounds = array<i64: 32, 16>}, {pipeline_mode = #tpu.pipeline_mode<synchronous>, transform_indices = @transform_2, window_bounds = array<i64: 32, 1>}, {pipeline_mode = #tpu.pipeline_mode<synchronous>, transform_indices = @transform_3, window_bounds = array<i64: 32, 1>}, {transform_indices = @transform_4, window_bounds = array<i64: 1>}, {transform_indices = @transform_5, window_bounds = array<i64: 1, 384>}]} {
    %c0 = arith.constant 0 : index
    %c0_0 = arith.constant 0 : index
    %0 = vector.load %arg2[%c0, %c0_0] : memref<32x16xf32, #tpu.memory_space<vmem>>, vector<32x16xf32>
    %c0_1 = arith.constant 0 : index
    %c0_2 = arith.constant 0 : index
    %1 = vector.load %arg1[%c0_1, %c0_2] : memref<16x384xf32, #tpu.memory_space<vmem>>, vector<16x384xf32>
    %cst = arith.constant dense<0.000000e+00> : vector<32x384xf32>
    %2 = tpu.matmul %0, %1, %cst {dimension_numbers = #tpu.dot_dimension_numbers<[1], [0], [0], [1], [0, 0, 1, 1], [], []>} : vector<32x16xf32>, vector<16x384xf32>, vector<32x384xf32> -> vector<32x384xf32>
    %c0_3 = arith.constant 0 : index
    %c0_4 = arith.constant 0 : index
    %3 = vector.load %arg3[%c0_3, %c0_4] : memref<32x1xf32, #tpu.memory_space<vmem>>, vector<32x1xf32>
    %4 = vector.broadcast %3 : vector<32x1xf32> to vector<32x384xf32>
    %5 = arith.addf %2, %4 : vector<32x384xf32>
    %cst_5 = arith.constant 0.000000e+00 : f32
    %6 = vector.broadcast %cst_5 : f32 to vector<32x384xf32>
    %7 = arith.maximumf %5, %6 : vector<32x384xf32>
    %c0_6 = arith.constant 0 : index
    %c0_7 = arith.constant 0 : index
    %8 = vector.load %arg4[%c0_6, %c0_7] : memref<32x1xf32, #tpu.memory_space<vmem>>, vector<32x1xf32>
    %9 = vector.broadcast %8 : vector<32x1xf32> to vector<32x384xf32>
    %10 = arith.mulf %7, %9 : vector<32x384xf32>
    %cst_8 = arith.constant dense<0.000000e+00> : vector<384xf32>
    %11 = vector.multi_reduction <add>, %10, %cst_8 [0] : vector<32x384xf32> to vector<384xf32>
    %12 = vector.shape_cast %11 : vector<384xf32> to vector<1x384xf32>
    %c0_9 = arith.constant 0 : index
    %13 = memref.load %arg5[%c0_9] : memref<1xf32, #tpu.memory_space<smem>>
    %14 = vector.broadcast %13 : f32 to vector<1x384xf32>
    %15 = arith.addf %12, %14 : vector<1x384xf32>
    %c0_10 = arith.constant 0 : index
    %c0_11 = arith.constant 0 : index
    %16 = vector.load %arg6[%c0_10, %c0_11] : memref<1x384xf32, #tpu.memory_space<vmem>>, vector<1x384xf32>
    tpu.vector_store %arg6[%c0_10, %c0_11], %15 {strides = array<i32>} : memref<1x384xf32, #tpu.memory_space<vmem>>, vector<1x384xf32>,
    return
  }
  func.func @transform_0(%arg0: i32) -> (i32, i32) {
    %c0_i32 = arith.constant 0 : i32
    %c0_i32_0 = arith.constant 0 : i32
    return %c0_i32, %arg0 : i32, i32
  }
  func.func @transform_1(%arg0: i32) -> (i32, i32) {
    %c0_i32 = arith.constant 0 : i32
    %c0_i32_0 = arith.constant 0 : i32
    %c0_i32_1 = arith.constant 0 : i32
    return %c0_i32, %c0_i32_0 : i32, i32
  }
  func.func @transform_2(%arg0: i32) -> (i32, i32) {
    %c0_i32 = arith.constant 0 : i32
    %c0_i32_0 = arith.constant 0 : i32
    %c0_i32_1 = arith.constant 0 : i32
    return %c0_i32, %c0_i32_0 : i32, i32
  }
  func.func @transform_3(%arg0: i32) -> (i32, i32) {
    %c0_i32 = arith.constant 0 : i32
    %c0_i32_0 = arith.constant 0 : i32
    %c0_i32_1 = arith.constant 0 : i32
    return %c0_i32, %c0_i32_0 : i32, i32
  }
  func.func @transform_4(%arg0: i32) -> i32 {
    %c0_i32 = arith.constant 0 : i32
    %c0_i32_0 = arith.constant 0 : i32
    return %c0_i32 : i32
  }
  func.func @transform_5(%arg0: i32) -> (i32, i32) {
    %c0_i32 = arith.constant 0 : i32
    %c0_i32_0 = arith.constant 0 : i32
    return %c0_i32, %arg0 : i32, i32
  }
}

</mosaic_0001>

<bundles_post_ra>
// kernel: tpu_custom_call.1
= control target key start
LH: loop header
LB: loop body
LE: loop exit
PB: predicated region body
PF: predicated region fallthrough
CT: control target
= control target key end

     0   :  { %vm56_vm0 = vcmask 130048   ;;  %v425_v7 = vmov 0.0   ;;  %s527_s0 = inlined_call_operand.vmem [shape: f32[16,384], index: 0, kind: input, shape index: {}]   ;;  %s528_s1 = inlined_call_operand.vmem [shape: f32[32,16], index: 1, kind: input, shape index: {}]   ;;  %s529_s2 = inlined_call_operand.vmem [shape: f32[32,1], index: 2, kind: input, shape index: {}]   ;;  %s530_s3 = inlined_call_operand.vmem [shape: f32[32,1], index: 3, kind: input, shape index: {}]   ;;  %s531_s4 = inlined_call_operand.<no memory space> [shape: f32[1], index: 4, kind: input, shape index: {}]   ;;  %s532_s5 = inlined_call_operand.hbm [shape: f32[1,384], index: 5, kind: output, shape index: {}]  }
   0x1   :  { %v30_v0 = vld [vmem:[%s527_s0 + $0x20] sm:$0xff]  ;;  %v29_v1 = vld [vmem:[%s527_s0 + $0x18] sm:$0xff]  ;;  %v27_v2 = vld [vmem:[%s527_s0 + $0x8] sm:$0xff]  ;;  %133 = vmatprep.mubr.f32.mxu0 %v425_v7  ;;  %151 = vmatprep.mubr.f32.mxu1 %v425_v7 }
   0x2   :  { %97 = vmatprep.subr.mxu0 %v30_v0  ;;  %393 = vmatprep.subr.mxu1 %v30_v0  ;;  %v26_v3 = vld [vmem:[%s527_s0] sm:$0xff]  ;;  %v25_v5 = vld [vmem:[%s528_s1 + $0x18] sm:$0xff]  ;;  %v31_v6 = vld [vmem:[%s527_s0 + $0x28] sm:$0xff] }
   0x3   :  { %98 = vmatpush1.msra.mxu0 %v29_v1  ;;  %395 = vmatpush1.msra.mxu1 %v29_v1  ;;  %v22_v4 = vld [vmem:[%s528_s1] sm:$0xff]  ;;  %v28_v8 = vld [vmem:[%s527_s0 + $0x10] sm:$0xff] }
   0x4   :  { %99 = vmatprep.subr.mxu0 %v27_v2  ;;  %394 = vmatprep.subr.mxu1 %v27_v2 }
   0x5   :  { %100 = vmatpush1.msra.mxu0 %v26_v3  ;;  %396 = vmatpush1.msra.mxu1 %v26_v3 }
   0x6   :  { %369 = vmatmul.mubr.msk.f32.vlgmr.msra.gmra.mxu0 %vm56_vm0, %v22_v4  ;;  %372 = vmatmul.mubr.msk.f32.vlgmr.msra.gmra.mxu1 %vm56_vm0, %v25_v5 }
   0x7   :  { %11 = vsyncpa [#allocation4], 0  ;;  %383 = vmatprep.subr.mxu1 %v31_v6  ;;  %139 = vmatprep.mubr.f32.mxu0 %v425_v7  ;;  %v23_v9 = vld [vmem:[%s528_s1 + $0x8] sm:$0xff]  ;;  %v24_v10 = vld [vmem:[%s528_s1 + $0x10] sm:$0xff]  ;;  %v426_v11 = vmov 0   ;;  %s428_s27 = smov [#allocation3]  }
   0x8   :  { %384 = vmatpush3.msra.mxu1 %v31_v6  ;;  %387 = vmatprep.mubr.msk.f32.mxu1 %vm56_vm0, %v22_v4  ;;  %v32_v12 = vld [vmem:[%s529_s2] sm:$0xff]  ;;  %v34_v13 = vld [vmem:[%s529_s2 + $0x10] sm:$0xff]  ;;  %v33_v14 = vld [vmem:[%s529_s2 + $0x8] sm:$0xff]  ;;  %s361_s28 = sshll.u32 %s428_s27, 4  ;;  %s362_s28 = int_to_ptr.vmem [resolvable:$true] %s361_s28 }
   0x9   :  { %385 = vmatprep.subr.mxu1 %v28_v8  ;;  %401 = vset.pattern.permute.xlu0 %v426_v11  ;;  %v35_v15 = vld [vmem:[%s529_s2 + $0x18] sm:$0xff]  ;;  %v255_v16 = vld [vmem:[%s530_s3] sm:$0xff]  ;;  %v256_v17 = vld [vmem:[%s530_s3 + $0x8] sm:$0xff]  ;;  %s403_s29 = scalar_lea.vmem %s362_s28, 48  ;;  %s407_s30 = scalar_lea.vmem %s362_s28, 64 }
   0xa   :  { %386 = vmatpush3.msra.mxu1 %v28_v8  ;;  %370 = vmatmul.mubr.msk.f32.gmra.mxu0 %vm56_vm0, %v23_v9  ;;  %v257_v18 = vld [vmem:[%s530_s3 + $0x10] sm:$0xff]  ;;  %v258_v19 = vld [vmem:[%s530_s3 + $0x18] sm:$0xff]  ;;  %p404_p0 = scmp.ne.s32.totalorder %s362_s28, %s403_s29  ;;  %p408_p1 = scmp.lt.s32.totalorder %s362_s28, %s362_s28 }
   0xb   :  { %388 = vmatmul.mubr.msk.f32.vlgmr.msra.gmra.mxu1 %vm56_vm0, %v23_v9  ;;  %145 = vmatprep.mubr.f32.mxu0 %v425_v7  ;;  %p409_p2 = scmp.lt.s32.totalorder %s407_s30, %s403_s29 }
   0xc   :  { %390 = vmatprep.mubr.msk.f32.mxu1 %vm56_vm0, %v24_v10  ;;  %38 = vperm.xlu0 %401, %v32_v12  }
   0xd   :  { %402 = vset.pattern.permute.xlu1 %v426_v11  ;;  %p410_p3 = por %p409_p2, %p408_p1 }
   0xe   :  { %371 = vmatmul.mubr.msk.f32.gmra.mxu0 %vm56_vm0, %v24_v10  ;;  %48 = vperm.xlu1 %402, %v34_v13  }
   0xf   :  { %391 = vmatmul.mubr.msk.f32.gmra.mxu1 %vm56_vm0, %v25_v5  ;;  %p411_p4 = pnand %p410_p3, %p404_p0 }
  0x10   :  { %43 = vperm.xlu0 %401, %v33_v14  }
  0x12   :  { %53 = vperm.xlu1 %402, %v35_v15  }
  0x14   :  { %261 = vperm.xlu0 %401, %v255_v16  }
  0x16   :  { %266 = vperm.xlu1 %402, %v256_v17  }
  0x18   :  { %271 = vperm.xlu0 %401, %v257_v18  }
  0x1a   :  { %276 = vperm.xlu1 %402, %v258_v19  }
  0x87   :  { %v39_v20 = vpop.permute.xlu0 %38 }
  0x89   :  { %v49_v21 = vpop.permute.xlu1 %48 }
  0x8b   :  { %v44_v22 = vpop.permute.xlu0 %43 }
  0x8d   :  { %v54_v23 = vpop.permute.xlu1 %53 }
  0x8f   :  { %v262_v30 = vpop.permute.xlu0 %261 }
  0x91   :  { %v267_v34 = vpop.permute.xlu1 %266 }
  0x93   :  { %v272_v60 = vpop.permute.xlu0 %271 }
  0x95   :  { %v277_v62 = vpop.permute.xlu1 %276 }
  0xc6   :  { %v135_v24 = vpop.f32.mrf.mxu0  ;;  %v153_v25 = vpop.f32.mrf.mxu1 }
  0xc7   :  { %v136_v28 = vadd.f32 %v135_v24, %v39_v20  ;;  %v154_v31 = vadd.f32 %v153_v25, %v54_v23 }
  0xc8   :  { %v137_v26 = vpop.f32.mrf.mxu0  ;;  %v155_v27 = vpop.f32.mrf.mxu1 }
  0xc9   :  { %v138_v32 = vadd.f32 %v137_v26, %v39_v20  ;;  %v243_v38 = vmax.f32 %v136_v28, 0.0  ;;  %v156_v41 = vadd.f32 %v155_v27, %v54_v23  ;;  %v252_v45 = vmax.f32 %v154_v31, 0.0 }
  0xca   :  { %v141_v29 = vpop.f32.mrf.mxu0 }
  0xcb   :  { %v389_v33 = vpop.f32.mrf.mxu1  ;;  %v142_v35 = vadd.f32 %v141_v29, %v44_v22  ;;  %v244_v46 = vmax.f32 %v138_v32, 0.0  ;;  %v279_v55 = vmul.f32 %v262_v30, %v243_v38  ;;  %v253_v61 = vmax.f32 %v156_v41, 0.0 }
  0xcc   :  { %v230_v36 = vadd.f32 %v389_v33, %v44_v22  ;;  %v143_v37 = vpop.f32.mrf.mxu0  ;;  %v288_v8 = vmul.f32 %v277_v62, %v252_v45  ;;  %v330_v32 = vlaneseq }
  0xcd   :  { %v144_v39 = vadd.f32 %v143_v37, %v44_v22  ;;  %v224_v40 = vpop.f32.mrf.mxu1  ;;  %v246_v42 = vmax.f32 %v142_v35, 0.0  ;;  %v280_v1 = vmul.f32 %v262_v30, %v244_v46  ;;  %v289_v14 = vmul.f32 %v277_v62, %v253_v61 }
  0xce   :  { %v225_v43 = vadd.f32 %v224_v40, %v39_v20  ;;  %v147_v44 = vpop.f32.mrf.mxu0  ;;  %v248_v51 = vmax.f32 %v230_v36, 0.0  ;;  %v331_v40 = vshrl.u32 %v330_v32, 7  ;;  %vm352_vm1 = vcmp.lt.s32.totalorder %v330_v32, 384 }
  0xcf   :  { %v247_v47 = vmax.f32 %v144_v39, 0.0  ;;  %v148_v48 = vadd.f32 %v147_v44, %v49_v21  ;;  %v392_v49 = vpop.f32.mrf.mxu1  ;;  %v282_v50 = vmul.f32 %v267_v34, %v246_v42  ;;  %v319_v42 = vstv %s531_s4 }
  0xd0   :  { %v245_v52 = vmax.f32 %v225_v43, 0.0  ;;  %v240_v53 = vadd.f32 %v392_v49, %v54_v23  ;;  %v149_v54 = vpop.f32.mrf.mxu0  ;;  %v284_v5 = vmul.f32 %v267_v34, %v248_v51 }
  0xd1   :  { %v283_v56 = vmul.f32 %v267_v34, %v247_v47  ;;  %v249_v57 = vmax.f32 %v148_v48, 0.0  ;;  %v150_v58 = vadd.f32 %v149_v54, %v49_v21  ;;  %v234_v59 = vpop.f32.mrf.mxu1  ;;  %v291_v2 = vadd.f32 %v282_v50, %v279_v55 }
  0xd2   :  { %v281_v63 = vmul.f32 %v262_v30, %v245_v52  ;;  %v235_v0 = vadd.f32 %v234_v59, %v49_v21  ;;  %v254_v6 = vmax.f32 %v240_v53, 0.0  ;;  %v427_v30 = vmov 1966171168  }
  0xd3   :  { %v285_v3 = vmul.f32 %v272_v60, %v249_v57  ;;  %v250_v4 = vmax.f32 %v150_v58, 0.0  ;;  %v300_v9 = vadd.f32 %v283_v56, %v280_v1  ;;  %v328_v31 = vunpack.c.l.s4 %v427_v30 }
  0xd4   :  { %v251_v7 = vmax.f32 %v235_v0, 0.0  ;;  %v309_v12 = vadd.f32 %v284_v5, %v281_v63  ;;  %v290_v17 = vmul.f32 %v277_v62, %v254_v6 }
  0xd5   :  { %v292_v10 = vadd.f32 %v291_v2, %v285_v3  ;;  %v286_v11 = vmul.f32 %v272_v60, %v250_v4  ;;  %v329_v39 = vunpack.c.0.s8 %v328_v31 }
  0xd6   :  { %v287_v13 = vmul.f32 %v272_v60, %v251_v7 }
  0xd7   :  { %v293_v15 = vadd.f32 %v292_v10, %v288_v8  ;;  %v301_v16 = vadd.f32 %v300_v9, %v286_v11  ;;  %v332_v47 = vsub.s32 %v329_v39, %v331_v40 }
  0xd8   :  { %v310_v18 = vadd.f32 %v309_v12, %v287_v13 }
  0xd9   :  { %v294_v19 = vrot.slane %v293_v15, 4  ;;  %v302_v20 = vadd.f32 %v301_v16, %v289_v14 }
  0xda   :  { %v311_v21 = vadd.f32 %v310_v18, %v290_v17 }
  0xdb   :  { %v295_v22 = vadd.f32 %v294_v19, %v293_v15  ;;  %v303_v23 = vrot.slane %v302_v20, 4 }
  0xdc   :  { %v312_v24 = vrot.slane %v311_v21, 4 }
  0xdd   :  { %v296_v25 = vrot.slane %v295_v22, 2  ;;  %v304_v26 = vadd.f32 %v303_v23, %v302_v20 }
  0xde   :  { %v313_v27 = vadd.f32 %v312_v24, %v311_v21 }
  0xdf   :  { %v297_v28 = vadd.f32 %v296_v25, %v295_v22  ;;  %v305_v29 = vrot.slane %v304_v26, 2 }
  0xe0   :  { %v314_v33 = vrot.slane %v313_v27, 2 }
  0xe1   :  { %v298_v34 = vrot.slane %v297_v28, 1  ;;  %v306_v35 = vadd.f32 %v305_v29, %v304_v26 }
  0xe2   :  { %v315_v36 = vadd.f32 %v314_v33, %v313_v27 }
  0xe3   :  { %v299_v37 = vadd.f32 %v298_v34, %v297_v28  ;;  %v307_v38 = vrot.slane %v306_v35, 1 }
  0xe4   :  { %v316_v41 = vrot.slane %v315_v36, 1 }
  0xe5   :  { %v308_v43 = vadd.f32 %v307_v38, %v306_v35  ;;  %v320_v45 = vadd.f32 %v319_v42, %v299_v37 }
  0xe6   :  { %v317_v44 = vadd.f32 %v316_v41, %v315_v36 }
  0xe7   :  { %v321_v46 = vadd.f32 %v319_v42, %v308_v43 }
  0xe8   :  { %v322_v48 = vadd.f32 %v319_v42, %v317_v44 }
  0xe9   :  { %v326_v49 = vcombine.low %v320_v45, %v321_v46 }
  0xea   :  { %v340_v51 = vrot.slane %v322_v48, %v332_v47 }
  0xeb   :  { %v333_v50 = vrot.slane %v326_v49, %v332_v47 }
  0xed   :  { %v341_v52 = vcombine.low %v333_v50, %v340_v51 }
  0xef   :  { %v348_v53 = vrot.slane %v341_v52, %v332_v47 }
  0xf1   :  { %354 = vst.msk [vmem:[#allocation3] sm:$0x7] %vm352_vm1, %v348_v53 }
  0xf2   :  { %414 = shalt.err (!%p411_p4)
}
  0xf3   :  { %364 = dma.vmem_to_hbm [thread:$0]  %s362_s28, 48, %s532_s5, [#allocation4]  }
  0xf4   :  { %423 = dma.done.wait [#allocation4], 48  }
  0xf5   :  { %424 = vsyncadd [#allocation4], 4294967248 }
  0xf6   :  { %368 = vsyncpa [#allocation4], 1 }

</bundles_post_ra>
